<compile_context>
chip_gen: v6e
topology: v6e:2x2x1
jax: 0.10.0
libtpu: 0.0.40
codegen_flags: <defaults>
</compile_context>

<pallas_src>
import jax
import jax.numpy as jnp
from jax.experimental import pallas as pl
from jax.experimental.pallas import tpu as pltpu


# ----------------------------------------------------------------------------
# Kernel
# ----------------------------------------------------------------------------
def policy_kernel(x_ref, w1_ref, b1_ref, w2_ref, b2_ref, w3_ref, b3_ref, out_ref):
    # x arrives f32 from HBM; in-kernel bf16 cast rides idle VPU slots.
    x = x_ref[...].astype(jnp.bfloat16)

    # ---- layer 1: Linear + ReLU (bf16 MXU matmul, f32 accumulate) ----
    h1 = jnp.dot(x, w1_ref[...], preferred_element_type=jnp.float32)
    h1 = jnp.maximum(h1 + b1_ref[...], 0.0)

    # ---- layer 2: Linear + ReLU ----
    h2 = jnp.dot(h1.astype(jnp.bfloat16), w2_ref[...],
                 preferred_element_type=jnp.float32)
    h2 = jnp.maximum(h2 + b2_ref[...], 0.0)

    # ---- output layer: Linear (action dim already padded to lane width) ----
    logits = jnp.dot(h2.astype(jnp.bfloat16), w3_ref[...],
                     preferred_element_type=jnp.float32)
    logits = logits + b3_ref[...]     # pad lanes carry bias = -1e30 -> exp() = 0

    # ---- softmax over the padded (lane-dense) action dim, all in f32 ----
    m = jnp.max(logits, axis=-1, keepdims=True)
    e = jnp.exp(logits - m)
    denom = jnp.sum(e, axis=-1, keepdims=True)
    out_ref[...] = (e * pl.reciprocal(denom, approx=True)).astype(out_ref.dtype)


# ----------------------------------------------------------------------------
# One-time parameter preparation (padding + bf16 casts happen ONCE, not per call)
# ----------------------------------------------------------------------------
def prepare_params(params):
    """Pad the action dim to a 128-lane multiple and cast weights to bf16."""
    w1, b1, w2, b2, w3, b3 = (params[k] for k in ("w1", "b1", "w2", "b2", "w3", "b3"))
    A = w3.shape[1]
    A_pad = pl.cdiv(A, 128) * 128
    w3p = jnp.pad(w3, ((0, 0), (0, A_pad - A)))                          # zeros
    b3p = jnp.pad(b3, ((0, 0), (0, A_pad - A)), constant_values=-1e30)   # -> exp=0
    prepared = {
        "w1": w1.astype(jnp.bfloat16), "b1": b1.astype(jnp.float32),
        "w2": w2.astype(jnp.bfloat16), "b2": b2.astype(jnp.float32),
        "w3": w3p.astype(jnp.bfloat16), "b3": b3p.astype(jnp.float32),
    }
    return jax.tree_util.tree_map(jax.device_put, prepared), A


# ----------------------------------------------------------------------------
# Tiling choice: as few grid steps as possible (2 on v7x -> one per TC,
# 1 on single-TC chips), capped so the batch tile stays well inside VMEM.
# ----------------------------------------------------------------------------
def _default_target_steps():
    try:
        kind = jax.devices()[0].device_kind.lower()
        if "v7" in kind:          # 2 TensorCores per chip -> keep exactly 2 steps
            return 2
    except Exception:
        pass
    return 1                      # v5e / v6e: single TC, one step is optimal


def _choose_tiling(batch, target_steps, max_tile_rows):
    steps = max(1, int(target_steps))
    tb = pl.cdiv(batch, steps * 8) * 8          # rows/step, multiple of 8 (sublane)
    tb = min(tb, max_tile_rows)
    b_pad = pl.cdiv(batch, tb) * tb
    return tb, b_pad


# ----------------------------------------------------------------------------
# Forward
# ----------------------------------------------------------------------------
def policy_network_forward(state, prepared, action_dim, *,
                           target_steps=None, max_tile_rows=4096,
                           out_dtype=jnp.float32):
    """state: (B, state_dim) f32. `prepared`, `action_dim` from prepare_params().

    Returns (B, action_dim) action probabilities in `out_dtype`.
    """
    w1, b1, w2, b2, w3, b3 = (prepared[k] for k in ("w1", "b1", "w2", "b2", "w3", "b3"))
    B, S = state.shape
    A_pad = w3.shape[1]

    if target_steps is None:
        target_steps = _default_target_steps()
    TB, B_pad = _choose_tiling(B, target_steps, max_tile_rows)

    x = state if B_pad == B else jnp.pad(state, ((0, B_pad - B), (0, 0)))

    grid = (B_pad // TB,)
    out = pl.pallas_call(
        policy_kernel,
        out_shape=jax.ShapeDtypeStruct((B_pad, A_pad), out_dtype),
        grid_spec=pltpu.PrefetchScalarGridSpec(
            num_scalar_prefetch=0,
            grid=grid,
            in_specs=[
                # x streams per batch tile (f32; cast to bf16 in-kernel)
                pl.BlockSpec((TB, S), lambda i: (i, 0)),
                # weights/biases: constant block index -> VMEM-resident across steps
                pl.BlockSpec(w1.shape, lambda i: (0, 0)),
                pl.BlockSpec(b1.shape, lambda i: (0, 0)),
                pl.BlockSpec(w2.shape, lambda i: (0, 0)),
                pl.BlockSpec(b2.shape, lambda i: (0, 0)),
                pl.BlockSpec(w3.shape, lambda i: (0, 0)),
                pl.BlockSpec(b3.shape, lambda i: (0, 0)),
            ],
            out_specs=pl.BlockSpec((TB, A_pad), lambda i: (i, 0)),
        ),
        compiler_params=pltpu.CompilerParams(
            dimension_semantics=("parallel",)),     # megacore sharding on v7x
    )(x, w1, b1, w2, b2, w3, b3)

    return out[:B, :action_dim]


# ----------------------------------------------------------------------------
# Deterministic synthetic init (PyTorch-Linear-like uniform fan-in)
# ----------------------------------------------------------------------------
def init_params(key, state_dim, action_dim, hidden_sizes=(128, 128)):
    dims = [state_dim, *hidden_sizes, action_dim]
    params = {}
    for i, (din, dout) in enumerate(zip(dims[:-1], dims[1:]), start=1):
        key, kw, kb = jax.random.split(key, 3)
        bound = 1.0 / (din ** 0.5)
        params[f"w{i}"] = jax.random.uniform(
            kw, (din, dout), jnp.float32, minval=-bound, maxval=bound)
        # biases kept 2-D (1, dout) so they broadcast cleanly inside the kernel
        params[f"b{i}"] = jax.random.uniform(
            kb, (1, dout), jnp.float32, minval=-bound, maxval=bound)
    return params


if __name__ == "__main__":
    key = jax.random.PRNGKey(0)
    batch, state_dim, action_dim = 256, 32, 16

    kp, kx = jax.random.split(key)
    params = init_params(kp, state_dim, action_dim, hidden_sizes=(128, 128))
    state = jax.random.normal(kx, (batch, state_dim), jnp.float32)

    # One-time weight prep (padding + bf16 casts) outside the per-call path.
    prepared, A = prepare_params(params)

    probs = policy_network_forward(state, prepared, A)
    jax.block_until_ready(probs)

    # sanity: reference in plain JAX (f32 everywhere)
    def ref(x, p):
        h = jnp.maximum(x @ p["w1"] + p["b1"], 0.0)
        h = jnp.maximum(h @ p["w2"] + p["b2"], 0.0)
        logits = h @ p["w3"] + p["b3"]
        return jax.nn.softmax(logits, axis=-1)

    expected = ref(state, params)
    assert probs.shape == (batch, action_dim)
    # bf16 matmul operands + approx reciprocal -> looser tolerances
    assert jnp.allclose(probs, expected, atol=2e-2), "mismatch vs reference"
    assert jnp.allclose(jnp.sum(probs, axis=-1), 1.0, atol=1e-2)

    print("KERNEL_OK")
</pallas_src>

<mosaic_0001>
module attributes {stable_mosaic.version = 11 : i64} {
  func.func @policy_kernel(%arg0: i32, %arg1: memref<256x32xf32, #tpu.memory_space<vmem>>, %arg2: memref<32x128xbf16, #tpu.memory_space<vmem>>, %arg3: memref<1x128xf32, #tpu.memory_space<vmem>>, %arg4: memref<128x128xbf16, #tpu.memory_space<vmem>>, %arg5: memref<1x128xf32, #tpu.memory_space<vmem>>, %arg6: memref<128x128xbf16, #tpu.memory_space<vmem>>, %arg7: memref<1x128xf32, #tpu.memory_space<vmem>>, %arg8: memref<256x128xf32, #tpu.memory_space<vmem>>) attributes {dimension_semantics = [#tpu.dimension_semantics<parallel>], iteration_bounds = array<i64: 1>, scalar_prefetch = 0 : i64, scratch_operands = 0 : i64, tpu.core_type = #tpu.core_type<tc>, window_params = [{transform_indices = @transform_0, window_bounds = array<i64: 256, 32>}, {pipeline_mode = #tpu.pipeline_mode<synchronous>, transform_indices = @transform_1, window_bounds = array<i64: 32, 128>}, {pipeline_mode = #tpu.pipeline_mode<synchronous>, transform_indices = @transform_2, window_bounds = array<i64: 1, 128>}, {pipeline_mode = #tpu.pipeline_mode<synchronous>, transform_indices = @transform_3, window_bounds = array<i64: 128, 128>}, {pipeline_mode = #tpu.pipeline_mode<synchronous>, transform_indices = @transform_4, window_bounds = array<i64: 1, 128>}, {pipeline_mode = #tpu.pipeline_mode<synchronous>, transform_indices = @transform_5, window_bounds = array<i64: 128, 128>}, {pipeline_mode = #tpu.pipeline_mode<synchronous>, transform_indices = @transform_6, window_bounds = array<i64: 1, 128>}, {transform_indices = @transform_7, window_bounds = array<i64: 256, 128>}]} {
    %c0 = arith.constant 0 : index
    %c0_0 = arith.constant 0 : index
    %0 = vector.load %arg1[%c0, %c0_0] : memref<256x32xf32, #tpu.memory_space<vmem>>, vector<256x32xf32>
    %1 = arith.truncf %0 : vector<256x32xf32> to vector<256x32xbf16>
    %c0_1 = arith.constant 0 : index
    %c0_2 = arith.constant 0 : index
    %2 = vector.load %arg2[%c0_1, %c0_2] : memref<32x128xbf16, #tpu.memory_space<vmem>>, vector<32x128xbf16>
    %cst = arith.constant dense<0.000000e+00> : vector<256x128xf32>
    %3 = tpu.matmul %1, %2, %cst {dimension_numbers = #tpu.dot_dimension_numbers<[1], [0], [0], [1], [0, 0, 1, 1], [], []>} : vector<256x32xbf16>, vector<32x128xbf16>, vector<256x128xf32> -> vector<256x128xf32>
    %c0_3 = arith.constant 0 : index
    %c0_4 = arith.constant 0 : index
    %4 = vector.load %arg3[%c0_3, %c0_4] : memref<1x128xf32, #tpu.memory_space<vmem>>, vector<1x128xf32>
    %5 = vector.broadcast %4 : vector<1x128xf32> to vector<256x128xf32>
    %6 = arith.addf %3, %5 : vector<256x128xf32>
    %cst_5 = arith.constant 0.000000e+00 : f32
    %7 = vector.broadcast %cst_5 : f32 to vector<256x128xf32>
    %8 = arith.maximumf %6, %7 : vector<256x128xf32>
    %9 = arith.truncf %8 : vector<256x128xf32> to vector<256x128xbf16>
    %c0_6 = arith.constant 0 : index
    %c0_7 = arith.constant 0 : index
    %10 = vector.load %arg4[%c0_6, %c0_7] : memref<128x128xbf16, #tpu.memory_space<vmem>>, vector<128x128xbf16>
    %cst_8 = arith.constant dense<0.000000e+00> : vector<256x128xf32>
    %11 = tpu.matmul %9, %10, %cst_8 {dimension_numbers = #tpu.dot_dimension_numbers<[1], [0], [0], [1], [0, 0, 1, 1], [], []>} : vector<256x128xbf16>, vector<128x128xbf16>, vector<256x128xf32> -> vector<256x128xf32>
    %c0_9 = arith.constant 0 : index
    %c0_10 = arith.constant 0 : index
    %12 = vector.load %arg5[%c0_9, %c0_10] : memref<1x128xf32, #tpu.memory_space<vmem>>, vector<1x128xf32>
    %13 = vector.broadcast %12 : vector<1x128xf32> to vector<256x128xf32>
    %14 = arith.addf %11, %13 : vector<256x128xf32>
    %cst_11 = arith.constant 0.000000e+00 : f32
    %15 = vector.broadcast %cst_11 : f32 to vector<256x128xf32>
    %16 = arith.maximumf %14, %15 : vector<256x128xf32>
    %17 = arith.truncf %16 : vector<256x128xf32> to vector<256x128xbf16>
    %c0_12 = arith.constant 0 : index
    %c0_13 = arith.constant 0 : index
    %18 = vector.load %arg6[%c0_12, %c0_13] : memref<128x128xbf16, #tpu.memory_space<vmem>>, vector<128x128xbf16>
    %cst_14 = arith.constant dense<0.000000e+00> : vector<256x128xf32>
    %19 = tpu.matmul %17, %18, %cst_14 {dimension_numbers = #tpu.dot_dimension_numbers<[1], [0], [0], [1], [0, 0, 1, 1], [], []>} : vector<256x128xbf16>, vector<128x128xbf16>, vector<256x128xf32> -> vector<256x128xf32>
    %c0_15 = arith.constant 0 : index
    %c0_16 = arith.constant 0 : index
    %20 = vector.load %arg7[%c0_15, %c0_16] : memref<1x128xf32, #tpu.memory_space<vmem>>, vector<1x128xf32>
    %21 = vector.broadcast %20 : vector<1x128xf32> to vector<256x128xf32>
    %22 = arith.addf %19, %21 : vector<256x128xf32>
    %cst_17 = arith.constant dense<0xFF800000> : vector<256xf32>
    %23 = vector.multi_reduction <maximumf>, %22, %cst_17 [1] : vector<256x128xf32> to vector<256xf32>
    %24 = vector.shape_cast %23 : vector<256xf32> to vector<256x1xf32>
    %25 = vector.broadcast %24 : vector<256x1xf32> to vector<256x128xf32>
    %26 = arith.subf %22, %25 : vector<256x128xf32>
    %27 = math.exp %26 : vector<256x128xf32>
    %cst_18 = arith.constant dense<0.000000e+00> : vector<256xf32>
    %28 = vector.multi_reduction <add>, %27, %cst_18 [1] : vector<256x128xf32> to vector<256xf32>
    %29 = vector.shape_cast %28 : vector<256xf32> to vector<256x1xf32>
    %30 = tpu.reciprocal %29 {approx = true} : vector<256x1xf32> -> vector<256x1xf32>
    %31 = vector.broadcast %30 : vector<256x1xf32> to vector<256x128xf32>
    %32 = arith.mulf %27, %31 : vector<256x128xf32>
    %c0_19 = arith.constant 0 : index
    %c0_20 = arith.constant 0 : index
    %33 = vector.load %arg8[%c0_19, %c0_20] : memref<256x128xf32, #tpu.memory_space<vmem>>, vector<256x128xf32>
    tpu.vector_store %arg8[%c0_19, %c0_20], %32 {strides = array<i32>} : memref<256x128xf32, #tpu.memory_space<vmem>>, vector<256x128xf32>,
    return
  }
  func.func @transform_0(%arg0: i32) -> (i32, i32) {
    %c0_i32 = arith.constant 0 : i32
    %c0_i32_0 = arith.constant 0 : i32
    return %arg0, %c0_i32 : i32, i32
  }
  func.func @transform_1(%arg0: i32) -> (i32, i32) {
    %c0_i32 = arith.constant 0 : i32
    %c0_i32_0 = arith.constant 0 : i32
    %c0_i32_1 = arith.constant 0 : i32
    return %c0_i32, %c0_i32_0 : i32, i32
  }
  func.func @transform_2(%arg0: i32) -> (i32, i32) {
    %c0_i32 = arith.constant 0 : i32
    %c0_i32_0 = arith.constant 0 : i32
    %c0_i32_1 = arith.constant 0 : i32
    return %c0_i32, %c0_i32_0 : i32, i32
  }
  func.func @transform_3(%arg0: i32) -> (i32, i32) {
    %c0_i32 = arith.constant 0 : i32
    %c0_i32_0 = arith.constant 0 : i32
    %c0_i32_1 = arith.constant 0 : i32
    return %c0_i32, %c0_i32_0 : i32, i32
  }
  func.func @transform_4(%arg0: i32) -> (i32, i32) {
    %c0_i32 = arith.constant 0 : i32
    %c0_i32_0 = arith.constant 0 : i32
    %c0_i32_1 = arith.constant 0 : i32
    return %c0_i32, %c0_i32_0 : i32, i32
  }
  func.func @transform_5(%arg0: i32) -> (i32, i32) {
    %c0_i32 = arith.constant 0 : i32
    %c0_i32_0 = arith.constant 0 : i32
    %c0_i32_1 = arith.constant 0 : i32
    return %c0_i32, %c0_i32_0 : i32, i32
  }
  func.func @transform_6(%arg0: i32) -> (i32, i32) {
    %c0_i32 = arith.constant 0 : i32
    %c0_i32_0 = arith.constant 0 : i32
    %c0_i32_1 = arith.constant 0 : i32
    return %c0_i32, %c0_i32_0 : i32, i32
  }
  func.func @transform_7(%arg0: i32) -> (i32, i32) {
    %c0_i32 = arith.constant 0 : i32
    %c0_i32_0 = arith.constant 0 : i32
    return %arg0, %c0_i32 : i32, i32
  }
}

</mosaic_0001>

<bundles_post_ra>
// kernel: tpu_custom_call.1
= control target key start
LH: loop header
LB: loop body
LE: loop exit
PB: predicated region body
PF: predicated region fallthrough
CT: control target
= control target key end

     0   :  { %vm99_vm0 = vcmask 261120   ;;  %s2209_s0 = inlined_call_operand.vmem [shape: f32[256,32], index: 0, kind: input, shape index: {}]   ;;  %s2210_s1 = inlined_call_operand.vmem [shape: bf16[32,128], index: 1, kind: input, shape index: {}]   ;;  %s2211_s2 = inlined_call_operand.vmem [shape: f32[1,128], index: 2, kind: input, shape index: {}]   ;;  %s2212_s3 = inlined_call_operand.vmem [shape: bf16[128,128], index: 3, kind: input, shape index: {}]   ;;  %s2213_s4 = inlined_call_operand.vmem [shape: f32[1,128], index: 4, kind: input, shape index: {}]   ;;  %s2214_s5 = inlined_call_operand.vmem [shape: bf16[128,128], index: 5, kind: input, shape index: {}]   ;;  %s2215_s6 = inlined_call_operand.vmem [shape: f32[1,128], index: 6, kind: input, shape index: {}]   ;;  %s2216_s7 = inlined_call_operand.hbm [shape: f32[256,128], index: 7, kind: output, shape index: {}]  }
   0x1   :  { %v1447_v0 = vld [vmem:[%s2210_s1 + $0x8] sm:$0xff]   ;;  %v1448_v1 = vld [vmem:[%s2210_s1] sm:$0xff]   ;;  %v30_v5 = vld [vmem:[%s2209_s0 + $0x10] sm:$0xff] }
   0x2   :  { %1308 = vmatprep.subr.bf16.mxu0 %v1447_v0  ;;  %v28_v2 = vld [vmem:[%s2209_s0] sm:$0xff]  ;;  %v29_v3 = vld [vmem:[%s2209_s0 + $0x8] sm:$0xff]  ;;  %1440 = vmatprep.subr.bf16.mxu1 %v1447_v0  ;;  %v31_v6 = vld [vmem:[%s2209_s0 + $0x18] sm:$0xff] }
   0x3   :  { %1309 = vmatpush3.bf16.msra.mxu0 %v1447_v0  ;;  %v60_v4 = vpack.c.bf16 %v29_v3, %v28_v2  ;;  %1442 = vmatpush3.bf16.msra.mxu1 %v1447_v0  ;;  %v32_v7 = vld [vmem:[%s2209_s0 + $0x20] sm:$0xff]  ;;  %v33_v8 = vld [vmem:[%s2209_s0 + $0x28] sm:$0xff]  ;;  %v61_v9 = vpack.c.bf16 %v31_v6, %v30_v5  ;;  %v46_v14 = vld [vmem:[%s2209_s0 + $0x90] sm:$0xff] }
   0x4   :  { %1310 = vmatprep.subr.bf16.mxu0 %v1448_v1  ;;  %1441 = vmatprep.subr.bf16.mxu1 %v1448_v1  ;;  %v62_v10 = vpack.c.bf16 %v33_v8, %v32_v7  ;;  %v44_v11 = vld [vmem:[%s2209_s0 + $0x80] sm:$0xff]  ;;  %v45_v12 = vld [vmem:[%s2209_s0 + $0x88] sm:$0xff]  ;;  %v47_v15 = vld [vmem:[%s2209_s0 + $0x98] sm:$0xff] }
   0x5   :  { %1312 = vmatprep.mubr.msk.bf16.mxu0 %vm99_vm0, %v60_v4  ;;  %v68_v13 = vpack.c.bf16 %v45_v12, %v44_v11  ;;  %v48_v16 = vld [vmem:[%s2209_s0 + $0xa0] sm:$0xff]  ;;  %v69_v17 = vpack.c.bf16 %v47_v15, %v46_v14  ;;  %v49_v18 = vld [vmem:[%s2209_s0 + $0xa8] sm:$0xff]  ;;  %v34_v19 = vld [vmem:[%s2209_s0 + $0x30] sm:$0xff] }
   0x6   :  { %v35_v20 = vld [vmem:[%s2209_s0 + $0x38] sm:$0xff]  ;;  %v36_v21 = vld [vmem:[%s2209_s0 + $0x40] sm:$0xff]  ;;  %v70_v22 = vpack.c.bf16 %v49_v18, %v48_v16  ;;  %v37_v23 = vld [vmem:[%s2209_s0 + $0x48] sm:$0xff] }
   0x7   :  { %1311 = vmatpush3.bf16.msra.mxu0 %v1448_v1  ;;  %1443 = vmatpush3.bf16.msra.mxu1 %v1448_v1  ;;  %v50_v24 = vld [vmem:[%s2209_s0 + $0xb0] sm:$0xff]  ;;  %v51_v25 = vld [vmem:[%s2209_s0 + $0xb8] sm:$0xff]  ;;  %v52_v26 = vld [vmem:[%s2209_s0 + $0xc0] sm:$0xff]  ;;  %v63_v29 = vpack.c.bf16 %v35_v20, %v34_v19  ;;  %v64_v31 = vpack.c.bf16 %v37_v23, %v36_v21 }
   0x8   :  { %1328 = vmatprep.mubr.msk.bf16.mxu1 %vm99_vm0, %v68_v13  ;;  %v53_v27 = vld [vmem:[%s2209_s0 + $0xc8] sm:$0xff]  ;;  %v1449_v28 = vld [vmem:[%s2212_s3 + $0x38] sm:$0xff]   ;;  %v1450_v30 = vld [vmem:[%s2212_s3 + $0x30] sm:$0xff]   ;;  %v71_v32 = vpack.c.bf16 %v51_v25, %v50_v24 }
   0x9   :  { %1344 = vmatprep.subr.bf16.mxu1 %v1449_v28  ;;  %v72_v33 = vpack.c.bf16 %v53_v27, %v52_v26  ;;  %v38_v34 = vld [vmem:[%s2209_s0 + $0x50] sm:$0xff]  ;;  %v39_v35 = vld [vmem:[%s2209_s0 + $0x58] sm:$0xff]  ;;  %v1451_v36 = vld [vmem:[%s2212_s3 + $0x28] sm:$0xff]  }
   0xa   :  { %1313 = vmatmul.mubr.msk.bf16.vlgmr.msra.gmra.mxu0 %vm99_vm0, %v61_v9  ;;  %1329 = vmatmul.mubr.msk.bf16.vlgmr.msra.gmra.mxu1 %vm99_vm0, %v69_v17  ;;  %v40_v37 = vld [vmem:[%s2209_s0 + $0x60] sm:$0xff]  ;;  %v41_v38 = vld [vmem:[%s2209_s0 + $0x68] sm:$0xff]  ;;  %v54_v39 = vld [vmem:[%s2209_s0 + $0xd0] sm:$0xff]  ;;  %v65_v44 = vpack.c.bf16 %v39_v35, %v38_v34 }
   0xb   :  { %1316 = vmatprep.mubr.msk.bf16.mxu0 %vm99_vm0, %v62_v10  ;;  %1332 = vmatprep.mubr.msk.bf16.mxu1 %vm99_vm0, %v70_v22  ;;  %v55_v40 = vld [vmem:[%s2209_s0 + $0xd8] sm:$0xff]  ;;  %v56_v41 = vld [vmem:[%s2209_s0 + $0xe0] sm:$0xff]  ;;  %v57_v42 = vld [vmem:[%s2209_s0 + $0xe8] sm:$0xff]  ;;  %v66_v45 = vpack.c.bf16 %v41_v38, %v40_v37 }
   0xc   :  { %1345 = vmatpush3.bf16.msra.mxu1 %v1449_v28  ;;  %v1452_v43 = vld [vmem:[%s2212_s3 + $0x20] sm:$0xff]   ;;  %v73_v46 = vpack.c.bf16 %v55_v40, %v54_v39  ;;  %v74_v47 = vpack.c.bf16 %v57_v42, %v56_v41  ;;  %v1453_v48 = vld [vmem:[%s2212_s3 + $0x18] sm:$0xff]  }
   0xd   :  { %1346 = vmatprep.subr.bf16.mxu1 %v1450_v30 }
  0x10   :  { %1347 = vmatpush3.bf16.msra.mxu1 %v1450_v30 }
  0x11   :  { %1348 = vmatprep.subr.bf16.mxu1 %v1451_v36 }
  0x12   :  { %1317 = vmatmul.mubr.msk.bf16.gmra.mxu0 %vm99_vm0, %v63_v29  ;;  %1333 = vmatmul.mubr.msk.bf16.gmra.mxu1 %vm99_vm0, %v71_v32 }
  0x13   :  { %1320 = vmatprep.mubr.msk.bf16.mxu0 %vm99_vm0, %v64_v31  ;;  %1336 = vmatprep.mubr.msk.bf16.mxu1 %vm99_vm0, %v72_v33 }
  0x14   :  { %1349 = vmatpush3.bf16.msra.mxu1 %v1451_v36 }
  0x15   :  { %1350 = vmatprep.subr.bf16.mxu1 %v1452_v43 }
  0x16   :  { %12 = vsyncpa [#allocation3], 0  ;;  %v42_v49 = vld [vmem:[%s2209_s0 + $0x70] sm:$0xff]  ;;  %v43_v50 = vld [vmem:[%s2209_s0 + $0x78] sm:$0xff] }
  0x17   :  { %v58_v51 = vld [vmem:[%s2209_s0 + $0xf0] sm:$0xff]  ;;  %v59_v52 = vld [vmem:[%s2209_s0 + $0xf8] sm:$0xff]  ;;  %v67_v53 = vpack.c.bf16 %v43_v50, %v42_v49  ;;  %v1455_v56 = vld [vmem:[%s2212_s3 + $0x8] sm:$0xff]  }
  0x18   :  { %1351 = vmatpush3.bf16.msra.mxu1 %v1452_v43  ;;  %v75_v54 = vpack.c.bf16 %v59_v52, %v58_v51  ;;  %v1454_v55 = vld [vmem:[%s2212_s3 + $0x10] sm:$0xff]   ;;  %v1456_v57 = vld [vmem:[%s2212_s3] sm:$0xff]   ;;  %v1457_v58 = vld [vmem:[%s2214_s5 + $0x38] sm:$0xff]  }
  0x19   :  { %1352 = vmatprep.subr.bf16.mxu1 %v1453_v48  ;;  %v1458_v59 = vld [vmem:[%s2214_s5 + $0x30] sm:$0xff]   ;;  %1392 = vmatprep.subr.bf16.mxu0 %v1457_v58  ;;  %v1459_v60 = vld [vmem:[%s2214_s5 + $0x28] sm:$0xff]   ;;  %v1460_v61 = vld [vmem:[%s2214_s5 + $0x20] sm:$0xff]  }
  0x1a   :  { %1321 = vmatmul.mubr.msk.bf16.gmra.mxu0 %vm99_vm0, %v65_v44  ;;  %1337 = vmatmul.mubr.msk.bf16.gmra.mxu1 %vm99_vm0, %v73_v46  ;;  %v1461_v62 = vld [vmem:[%s2214_s5 + $0x18] sm:$0xff]   ;;  %v1820_v2 = vld [vmem:[%s2211_s2] ss:$0 sm:$0xff] }
  0x1b   :  { %1324 = vmatprep.mubr.msk.bf16.mxu0 %vm99_vm0, %v66_v45  ;;  %1340 = vmatprep.mubr.msk.bf16.mxu1 %vm99_vm0, %v74_v47 }
  0x1c   :  { %1353 = vmatpush3.bf16.msra.mxu1 %v1453_v48  ;;  %1393 = vmatpush3.bf16.msra.mxu0 %v1457_v58 }
  0x1d   :  { %1354 = vmatprep.subr.bf16.mxu1 %v1454_v55  ;;  %1394 = vmatprep.subr.bf16.mxu0 %v1458_v59 }
  0x20   :  { %1355 = vmatpush3.bf16.msra.mxu1 %v1454_v55  ;;  %1395 = vmatpush3.bf16.msra.mxu0 %v1458_v59 }
  0x21   :  { %1356 = vmatprep.subr.bf16.mxu1 %v1455_v56  ;;  %1396 = vmatprep.subr.bf16.mxu0 %v1459_v60 }
  0x22   :  { %1325 = vmatmul.mubr.msk.bf16.gmra.mxu0 %vm99_vm0, %v67_v53  ;;  %1341 = vmatmul.mubr.msk.bf16.gmra.mxu1 %vm99_vm0, %v75_v54 }
  0x24   :  { %1357 = vmatpush3.bf16.msra.mxu1 %v1455_v56  ;;  %1397 = vmatpush3.bf16.msra.mxu0 %v1459_v60 }
  0x25   :  { %1358 = vmatprep.subr.bf16.mxu1 %v1456_v57  ;;  %1398 = vmatprep.subr.bf16.mxu0 %v1460_v61 }
  0x28   :  { %1359 = vmatpush3.bf16.msra.mxu1 %v1456_v57  ;;  %1399 = vmatpush3.bf16.msra.mxu0 %v1460_v61 }
  0x29   :  { %1400 = vmatprep.subr.bf16.mxu0 %v1461_v62 }
  0x2c   :  { %1401 = vmatpush3.bf16.msra.mxu0 %v1461_v62 }
  0xca   :  { %v1314_v63 = vpop.f32.mrf.mxu0  ;;  %v1815_v0 = vpop.f32.mrf.mxu1 }
  0xcb   :  { %v191_v8 = vadd.f32 %v1314_v63, %v1820_v2 }
  0xcc   :  { %v182_v1 = vpop.f32.mrf.mxu0  ;;  %v246_v3 = vpop.f32.mrf.mxu1 }
  0xcd   :  { %v183_v5 = vadd.f32 %v1820_v2, %v182_v1  ;;  %v311_v17 = vmax.f32 %v191_v8, 0.0  ;;  %v247_v53 = vadd.f32 %v1820_v2, %v246_v3 }
  0xce   :  { %v1315_v4 = vpop.f32.mrf.mxu0  ;;  %v1824_v7 = vpop.f32.mrf.mxu1 }
  0xcf   :  { %v194_v6 = vadd.f32 %v1315_v4, %v1820_v2  ;;  %v309_v14 = vmax.f32 %v183_v5, 0.0  ;;  %v325_v62 = vmax.f32 %v247_v53, 0.0  ;;  %v1879_v53 = vld [vmem:[%s2213_s4] ss:$0 sm:$0xff] }
  0xd0   :  { %v185_v9 = vpop.f32.mrf.mxu0  ;;  %v249_v11 = vpop.f32.mrf.mxu1 }
  0xd1   :  { %v186_v10 = vadd.f32 %v1820_v2, %v185_v9  ;;  %v312_v12 = vmax.f32 %v194_v6, 0.0  ;;  %v250_v54 = vadd.f32 %v1820_v2, %v249_v11 }
  0xd2   :  { %v1318_v13 = vpop.f32.mrf.mxu0  ;;  %v1828_v16 = vpop.f32.mrf.mxu1 }
  0xd3   :  { %v310_v15 = vmax.f32 %v186_v10, 0.0  ;;  %v342_v21 = vpack.c.bf16 %v312_v12, %v311_v17  ;;  %v207_v26 = vadd.f32 %v1318_v13, %v1820_v2  ;;  %v326_v1 = vmax.f32 %v250_v54, 0.0 }
  0xd4   :  { %v198_v18 = vpop.f32.mrf.mxu0  ;;  %v262_v20 = vpop.f32.mrf.mxu1  ;;  %v255_v13 = vadd.f32 %v1815_v0, %v1820_v2  ;;  %v271_v0 = vadd.f32 %v1828_v16, %v1820_v2 }
  0xd5   :  { %v341_v19 = vpack.c.bf16 %v310_v15, %v309_v14  ;;  %v199_v23 = vadd.f32 %v1820_v2, %v198_v18  ;;  %v315_v34 = vmax.f32 %v207_v26, 0.0  ;;  %v349_v10 = vpack.c.bf16 %v326_v1, %v325_v62 }
  0xd6   :  { %v1319_v22 = vpop.f32.mrf.mxu0  ;;  %v1832_v25 = vpop.f32.mrf.mxu1  ;;  %v263_v11 = vadd.f32 %v1820_v2, %v262_v20  ;;  %v258_v15 = vadd.f32 %v1824_v7, %v1820_v2 }
  0xd7   :  { %v210_v24 = vadd.f32 %v1319_v22, %v1820_v2  ;;  %1360 = vmatprep.mubr.bf16.mxu1 %v341_v19  ;;  %v313_v32 = vmax.f32 %v199_v23, 0.0  ;;  %v274_v7 = vadd.f32 %v1832_v25, %v1820_v2 }
  0xd8   :  { %v201_v27 = vpop.f32.mrf.mxu0  ;;  %1361 = vmatmul.mubr.bf16.vlgmr.msra.gmra.mxu1 %v342_v21  ;;  %v265_v31 = vpop.f32.mrf.mxu1  ;;  %v329_v18 = vmax.f32 %v263_v11, 0.0  ;;  %v327_v21 = vmax.f32 %v255_v13, 0.0  ;;  %v328_v22 = vmax.f32 %v258_v15, 0.0 }
  0xd9   :  { %v202_v28 = vadd.f32 %v1820_v2, %v201_v27  ;;  %v316_v29 = vmax.f32 %v210_v24, 0.0  ;;  %v266_v12 = vadd.f32 %v1820_v2, %v265_v31  ;;  %v331_v31 = vmax.f32 %v271_v0, 0.0 }
  0xda   :  { %v1322_v30 = vpop.f32.mrf.mxu0  ;;  %v1836_v39 = vpop.f32.mrf.mxu1  ;;  %v350_v27 = vpack.c.bf16 %v328_v22, %v327_v21 }
  0xdb   :  { %v314_v33 = vmax.f32 %v202_v28, 0.0  ;;  %v344_v37 = vpack.c.bf16 %v316_v29, %v315_v34  ;;  %v223_v42 = vadd.f32 %v1322_v30, %v1820_v2  ;;  %v330_v19 = vmax.f32 %v266_v12, 0.0 }
  0xdc   :  { %v214_v35 = vpop.f32.mrf.mxu0  ;;  %v278_v47 = vpop.f32.mrf.mxu1  ;;  %v287_v16 = vadd.f32 %v1836_v39, %v1820_v2  ;;  %v1462_v39 = vld [vmem:[%s2214_s5 + $0x10] sm:$0xff]  }
  0xdd   :  { %v343_v36 = vpack.c.bf16 %v314_v33, %v313_v32  ;;  %v215_v40 = vadd.f32 %v1820_v2, %v214_v35  ;;  %v319_v50 = vmax.f32 %v223_v42, 0.0  ;;  %v351_v24 = vpack.c.bf16 %v330_v19, %v329_v18  ;;  %1402 = vmatprep.subr.bf16.mxu0 %v1462_v39 }
  0xde   :  { %v1323_v38 = vpop.f32.mrf.mxu0  ;;  %v1339_v57 = vpop.f32.mrf.mxu1  ;;  %v279_v20 = vadd.f32 %v1820_v2, %v278_v47  ;;  %v332_v32 = vmax.f32 %v274_v7, 0.0  ;;  %1403 = vmatpush3.bf16.msra.mxu0 %v1462_v39 }
  0xdf   :  { %v226_v41 = vadd.f32 %v1323_v38, %v1820_v2  ;;  %1364 = vmatprep.mubr.bf16.mxu1 %v343_v36  ;;  %v317_v48 = vmax.f32 %v215_v40, 0.0  ;;  %v290_v38 = vadd.f32 %v1339_v57, %v1820_v2 }
  0xe0   :  { %v217_v43 = vpop.f32.mrf.mxu0  ;;  %1365 = vmatmul.mubr.bf16.gmra.mxu1 %v344_v37  ;;  %v281_v3 = vpop.f32.mrf.mxu1  ;;  %v333_v29 = vmax.f32 %v279_v20, 0.0  ;;  %v352_v37 = vpack.c.bf16 %v332_v32, %v331_v31 }
  0xe1   :  { %v218_v44 = vadd.f32 %v1820_v2, %v217_v43  ;;  %v320_v45 = vmax.f32 %v226_v41, 0.0  ;;  %v282_v26 = vadd.f32 %v1820_v2, %v281_v3  ;;  %v335_v41 = vmax.f32 %v287_v16, 0.0 }
  0xe2   :  { %v1326_v46 = vpop.f32.mrf.mxu0  ;;  %v1342_v17 = vpop.f32.mrf.mxu1  ;;  %v336_v42 = vmax.f32 %v290_v38, 0.0 }
  0xe3   :  { %v318_v49 = vmax.f32 %v218_v44, 0.0  ;;  %v346_v55 = vpack.c.bf16 %v320_v45, %v319_v50  ;;  %v239_v60 = vadd.f32 %v1326_v46, %v1820_v2  ;;  %v334_v30 = vmax.f32 %v282_v26, 0.0  ;;  %v1463_v50 = vld [vmem:[%s2214_s5 + $0x8] sm:$0xff]  }
  0xe4   :  { %v230_v51 = vpop.f32.mrf.mxu0  ;;  %v294_v23 = vpop.f32.mrf.mxu1  ;;  %v354_v44 = vpack.c.bf16 %v336_v42, %v335_v41  ;;  %v303_v45 = vadd.f32 %v1342_v17, %v1820_v2  ;;  %1404 = vmatprep.subr.bf16.mxu0 %v1463_v50 }
  0xe5   :  { %v345_v52 = vpack.c.bf16 %v318_v49, %v317_v48  ;;  %v231_v58 = vadd.f32 %v1820_v2, %v230_v51  ;;  %v323_v8 = vmax.f32 %v239_v60, 0.0  ;;  %v353_v34 = vpack.c.bf16 %v334_v30, %v333_v29  ;;  %1405 = vmatpush3.bf16.msra.mxu0 %v1463_v50 }
  0xe6   :  { %v1327_v56 = vpop.f32.mrf.mxu0  ;;  %v1343_v28 = vpop.f32.mrf.mxu1  ;;  %v295_v35 = vadd.f32 %v1820_v2, %v294_v23  ;;  %v339_v47 = vmax.f32 %v303_v45, 0.0 }
  0xe7   :  { %v242_v59 = vadd.f32 %v1327_v56, %v1820_v2  ;;  %1368 = vmatprep.mubr.bf16.mxu1 %v345_v52  ;;  %v321_v5 = vmax.f32 %v231_v58, 0.0  ;;  %v306_v46 = vadd.f32 %v1343_v28, %v1820_v2 }
  0xe8   :  { %v233_v61 = vpop.f32.mrf.mxu0  ;;  %1369 = vmatmul.mubr.bf16.gmra.mxu1 %v346_v55  ;;  %v297_v33 = vpop.f32.mrf.mxu1  ;;  %v337_v25 = vmax.f32 %v295_v35, 0.0 }
  0xe9   :  { %v234_v63 = vadd.f32 %v1820_v2, %v233_v61  ;;  %v324_v4 = vmax.f32 %v242_v59, 0.0  ;;  %v298_v36 = vadd.f32 %v1820_v2, %v297_v33  ;;  %v340_v48 = vmax.f32 %v306_v46, 0.0  ;;  %v1464_v2 = vld [vmem:[%s2214_s5] sm:$0xff]  }
  0xea   :  { %1406 = vmatprep.subr.bf16.mxu0 %v1464_v2 }
  0xeb   :  { %v322_v6 = vmax.f32 %v234_v63, 0.0  ;;  %v348_v14 = vpack.c.bf16 %v324_v4, %v323_v8  ;;  %v338_v40 = vmax.f32 %v298_v36, 0.0  ;;  %v356_v49 = vpack.c.bf16 %v340_v48, %v339_v47  ;;  %1407 = vmatpush3.bf16.msra.mxu0 %v1464_v2 }
  0xed   :  { %v347_v9 = vpack.c.bf16 %v322_v6, %v321_v5  ;;  %v355_v43 = vpack.c.bf16 %v338_v40, %v337_v25 }
  0xef   :  { %1372 = vmatprep.mubr.bf16.mxu1 %v347_v9 }
  0xf0   :  { %1373 = vmatmul.mubr.bf16.gmra.mxu1 %v348_v14 }
  0xf1   :  { %1376 = vmatprep.mubr.bf16.mxu1 %v349_v10 }
  0xf8   :  { %1377 = vmatmul.mubr.bf16.gmra.mxu1 %v350_v27 }
  0xf9   :  { %1380 = vmatprep.mubr.bf16.mxu1 %v351_v24 }
 0x100   :  { %1381 = vmatmul.mubr.bf16.gmra.mxu1 %v352_v37 }
 0x101   :  { %1384 = vmatprep.mubr.bf16.mxu1 %v353_v34 }
 0x108   :  { %1385 = vmatmul.mubr.bf16.gmra.mxu1 %v354_v44 }
 0x109   :  { %1388 = vmatprep.mubr.bf16.mxu1 %v355_v43 }
 0x110   :  { %1389 = vmatmul.mubr.bf16.gmra.mxu1 %v356_v49 }
 0x198   :  { %v1362_v51 = vpop.f32.mrf.mxu1 }
 0x199   :  { %v471_v57 = vadd.f32 %v1362_v51, %v1879_v53 }
 0x19a   :  { %v462_v52 = vpop.f32.mrf.mxu1 }
 0x19b   :  { %v463_v55 = vadd.f32 %v1879_v53, %v462_v52  ;;  %v591_v1 = vmax.f32 %v471_v57, 0.0 }
 0x19c   :  { %v1363_v54 = vpop.f32.mrf.mxu1 }
 0x19d   :  { %v474_v56 = vadd.f32 %v1363_v54, %v1879_v53  ;;  %v589_v62 = vmax.f32 %v463_v55, 0.0 }
 0x19e   :  { %v465_v58 = vpop.f32.mrf.mxu1 }
 0x19f   :  { %v466_v59 = vadd.f32 %v1879_v53, %v465_v58  ;;  %v592_v60 = vmax.f32 %v474_v56, 0.0 }
 0x1a0   :  { %v1366_v61 = vpop.f32.mrf.mxu1 }
 0x1a1   :  { %v590_v63 = vmax.f32 %v466_v59, 0.0  ;;  %v622_v5 = vpack.c.bf16 %v592_v60, %v591_v1  ;;  %v487_v10 = vadd.f32 %v1366_v61, %v1879_v53 }
 0x1a2   :  { %v478_v4 = vpop.f32.mrf.mxu1 }
 0x1a3   :  { %v621_v3 = vpack.c.bf16 %v590_v63, %v589_v62  ;;  %v479_v8 = vadd.f32 %v1879_v53, %v478_v4  ;;  %v595_v18 = vmax.f32 %v487_v10, 0.0 }
 0x1a4   :  { %v1367_v6 = vpop.f32.mrf.mxu1 }
 0x1a5   :  { %v490_v9 = vadd.f32 %v1367_v6, %v1879_v53  ;;  %1408 = vmatprep.mubr.bf16.mxu0 %v621_v3  ;;  %v593_v15 = vmax.f32 %v479_v8, 0.0 }
 0x1a6   :  { %v481_v11 = vpop.f32.mrf.mxu1  ;;  %1409 = vmatmul.mubr.bf16.vlgmr.msra.gmra.mxu0 %v622_v5 }
 0x1a7   :  { %v482_v12 = vadd.f32 %v1879_v53, %v481_v11  ;;  %v596_v13 = vmax.f32 %v490_v9, 0.0 }
 0x1a8   :  { %v1370_v14 = vpop.f32.mrf.mxu1 }
 0x1a9   :  { %v594_v17 = vmax.f32 %v482_v12, 0.0  ;;  %v624_v22 = vpack.c.bf16 %v596_v13, %v595_v18  ;;  %v503_v26 = vadd.f32 %v1370_v14, %v1879_v53 }
 0x1aa   :  { %v494_v19 = vpop.f32.mrf.mxu1 }
 0x1ab   :  { %v623_v21 = vpack.c.bf16 %v594_v17, %v593_v15  ;;  %v495_v24 = vadd.f32 %v1879_v53, %v494_v19  ;;  %v599_v31 = vmax.f32 %v503_v26, 0.0 }
 0x1ac   :  { %v1371_v23 = vpop.f32.mrf.mxu1 }
 0x1ad   :  { %v506_v20 = vadd.f32 %v1371_v23, %v1879_v53  ;;  %1412 = vmatprep.mubr.bf16.mxu0 %v623_v21  ;;  %v597_v29 = vmax.f32 %v495_v24, 0.0 }
 0x1ae   :  { %v497_v27 = vpop.f32.mrf.mxu1  ;;  %1413 = vmatmul.mubr.bf16.gmra.mxu0 %v624_v22 }
 0x1af   :  { %v498_v0 = vadd.f32 %v1879_v53, %v497_v27  ;;  %v600_v7 = vmax.f32 %v506_v20, 0.0 }
 0x1b0   :  { %v1374_v28 = vpop.f32.mrf.mxu1 }
 0x1b1   :  { %v598_v30 = vmax.f32 %v498_v0, 0.0  ;;  %v626_v34 = vpack.c.bf16 %v600_v7, %v599_v31  ;;  %v519_v16 = vadd.f32 %v1374_v28, %v1879_v53 }
 0x1b2   :  { %v510_v32 = vpop.f32.mrf.mxu1 }
 0x1b3   :  { %v625_v33 = vpack.c.bf16 %v598_v30, %v597_v29  ;;  %v511_v36 = vadd.f32 %v1879_v53, %v510_v32  ;;  %v603_v44 = vmax.f32 %v519_v16, 0.0 }
 0x1b4   :  { %v1375_v35 = vpop.f32.mrf.mxu1 }
 0x1b5   :  { %v522_v37 = vadd.f32 %v1375_v35, %v1879_v53  ;;  %1416 = vmatprep.mubr.bf16.mxu0 %v625_v33  ;;  %v601_v42 = vmax.f32 %v511_v36, 0.0 }
 0x1b6   :  { %v513_v38 = vpop.f32.mrf.mxu1  ;;  %1417 = vmatmul.mubr.bf16.gmra.mxu0 %v626_v34 }
 0x1b7   :  { %v514_v25 = vadd.f32 %v1879_v53, %v513_v38  ;;  %v604_v40 = vmax.f32 %v522_v37, 0.0 }
 0x1b8   :  { %v1378_v41 = vpop.f32.mrf.mxu1 }
 0x1b9   :  { %v602_v43 = vmax.f32 %v514_v25, 0.0  ;;  %v628_v47 = vpack.c.bf16 %v604_v40, %v603_v44  ;;  %v535_v50 = vadd.f32 %v1378_v41, %v1879_v53  ;;  %v1916_v25 = vld [vmem:[%s2215_s6] ss:$0 sm:$0xff]  ;;  %s1615_s6 = smov [#allocation2]  }
 0x1ba   :  { %v526_v45 = vpop.f32.mrf.mxu1  ;;  %s1194_s29 = sshll.u32 %s1615_s6, 4  ;;  %s1195_s29 = int_to_ptr.vmem [resolvable:$true] %s1194_s29 }
 0x1bb   :  { %v627_v46 = vpack.c.bf16 %v602_v43, %v601_v42  ;;  %v527_v49 = vadd.f32 %v1879_v53, %v526_v45  ;;  %v607_v57 = vmax.f32 %v535_v50, 0.0  ;;  %s1593_s30 = scalar_lea.vmem %s1195_s29, 4096  ;;  %p1598_p1 = scmp.lt.s32.totalorder %s1195_s29, %s1195_s29 }
 0x1bc   :  { %v1379_v48 = vpop.f32.mrf.mxu1  ;;  %p1594_p0 = scmp.ne.s32.totalorder %s1195_s29, %s1593_s30  ;;  %p1599_p2 = scmp.lt.s32.totalorder %s1593_s30, %s1593_s30 }
 0x1bd   :  { %v538_v39 = vadd.f32 %v1379_v48, %v1879_v53  ;;  %1420 = vmatprep.mubr.bf16.mxu0 %v627_v46  ;;  %v605_v55 = vmax.f32 %v527_v49, 0.0 }
 0x1be   :  { %v529_v2 = vpop.f32.mrf.mxu1  ;;  %1421 = vmatmul.mubr.bf16.gmra.mxu0 %v628_v47  ;;  %p1600_p3 = por %p1599_p2, %p1598_p1 }
 0x1bf   :  { %v530_v51 = vadd.f32 %v1879_v53, %v529_v2  ;;  %v608_v52 = vmax.f32 %v538_v39, 0.0 }
 0x1c0   :  { %v1382_v54 = vpop.f32.mrf.mxu1  ;;  %p1601_p4 = pnand %p1600_p3, %p1594_p0 }
 0x1c1   :  { %v606_v56 = vmax.f32 %v530_v51, 0.0  ;;  %v630_v60 = vpack.c.bf16 %v608_v52, %v607_v57  ;;  %v551_v1 = vadd.f32 %v1382_v54, %v1879_v53 }
 0x1c2   :  { %v542_v58 = vpop.f32.mrf.mxu1 }
 0x1c3   :  { %v629_v59 = vpack.c.bf16 %v606_v56, %v605_v55  ;;  %v543_v62 = vadd.f32 %v1879_v53, %v542_v58  ;;  %v611_v10 = vmax.f32 %v551_v1, 0.0 }
 0x1c4   :  { %v1383_v61 = vpop.f32.mrf.mxu1 }
 0x1c5   :  { %v554_v63 = vadd.f32 %v1383_v61, %v1879_v53  ;;  %1424 = vmatprep.mubr.bf16.mxu0 %v629_v59  ;;  %v609_v8 = vmax.f32 %v543_v62, 0.0 }
 0x1c6   :  { %v545_v4 = vpop.f32.mrf.mxu1  ;;  %1425 = vmatmul.mubr.bf16.gmra.mxu0 %v630_v60 }
 0x1c7   :  { %v546_v3 = vadd.f32 %v1879_v53, %v545_v4  ;;  %v612_v5 = vmax.f32 %v554_v63, 0.0 }
 0x1c8   :  { %v1386_v6 = vpop.f32.mrf.mxu1 }
 0x1c9   :  { %v610_v9 = vmax.f32 %v546_v3, 0.0  ;;  %v632_v13 = vpack.c.bf16 %v612_v5, %v611_v10  ;;  %v567_v18 = vadd.f32 %v1386_v6, %v1879_v53 }
 0x1ca   :  { %v558_v11 = vpop.f32.mrf.mxu1 }
 0x1cb   :  { %v631_v12 = vpack.c.bf16 %v610_v9, %v609_v8  ;;  %v559_v15 = vadd.f32 %v1879_v53, %v558_v11  ;;  %v615_v26 = vmax.f32 %v567_v18, 0.0 }
 0x1cc   :  { %v1387_v14 = vpop.f32.mrf.mxu1 }
 0x1cd   :  { %v570_v17 = vadd.f32 %v1387_v14, %v1879_v53  ;;  %1428 = vmatprep.mubr.bf16.mxu0 %v631_v12  ;;  %v613_v24 = vmax.f32 %v559_v15, 0.0 }
 0x1ce   :  { %v561_v19 = vpop.f32.mrf.mxu1  ;;  %1429 = vmatmul.mubr.bf16.gmra.mxu0 %v632_v13 }
 0x1cf   :  { %v562_v21 = vadd.f32 %v1879_v53, %v561_v19  ;;  %v616_v22 = vmax.f32 %v570_v17, 0.0 }
 0x1d0   :  { %v1390_v23 = vpop.f32.mrf.mxu1 }
 0x1d1   :  { %v614_v20 = vmax.f32 %v562_v21, 0.0  ;;  %v634_v7 = vpack.c.bf16 %v616_v22, %v615_v26  ;;  %v583_v31 = vadd.f32 %v1390_v23, %v1879_v53 }
 0x1d2   :  { %v574_v27 = vpop.f32.mrf.mxu1 }
 0x1d3   :  { %v633_v0 = vpack.c.bf16 %v614_v20, %v613_v24  ;;  %v575_v29 = vadd.f32 %v1879_v53, %v574_v27  ;;  %v619_v37 = vmax.f32 %v583_v31, 0.0 }
 0x1d4   :  { %v1391_v28 = vpop.f32.mrf.mxu1 }
 0x1d5   :  { %v586_v30 = vadd.f32 %v1391_v28, %v1879_v53  ;;  %1432 = vmatprep.mubr.bf16.mxu0 %v633_v0  ;;  %v617_v35 = vmax.f32 %v575_v29, 0.0 }
 0x1d6   :  { %v577_v32 = vpop.f32.mrf.mxu1  ;;  %1433 = vmatmul.mubr.bf16.gmra.mxu0 %v634_v7 }
 0x1d7   :  { %v578_v33 = vadd.f32 %v1879_v53, %v577_v32  ;;  %v620_v34 = vmax.f32 %v586_v30, 0.0 }
 0x1d9   :  { %v618_v36 = vmax.f32 %v578_v33, 0.0  ;;  %v636_v38 = vpack.c.bf16 %v620_v34, %v619_v37 }
 0x1db   :  { %v635_v16 = vpack.c.bf16 %v618_v36, %v617_v35 }
 0x1dd   :  { %1436 = vmatprep.mubr.bf16.mxu0 %v635_v16 }
 0x1de   :  { %1437 = vmatmul.mubr.bf16.gmra.mxu0 %v636_v38 }
 0x266   :  { %v1410_v40 = vpop.f32.mrf.mxu0 }
 0x267   :  { %v1919_v41 = vadd.f32 %v1410_v40, %v1916_v25 }
 0x268   :  { %v742_v42 = vpop.f32.mrf.mxu0 }
 0x269   :  { %v1922_v53 = vadd.f32 %v1916_v25, %v742_v42  ;;  %873 = vmax.xlane.f32.xlu1 %v1919_v41 }
 0x26a   :  { %v1411_v43 = vpop.f32.mrf.mxu0 }
 0x26b   :  { %v1926_v44 = vadd.f32 %v1411_v43, %v1916_v25  ;;  %869 = vmax.xlane.f32.xlu0 %v1922_v53 }
 0x26c   :  { %v745_v45 = vpop.f32.mrf.mxu0 }
 0x26d   :  { %v1930_v46 = vadd.f32 %v1916_v25, %v745_v45  ;;  %875 = vmax.xlane.f32.xlu1 %v1926_v44 }
 0x26e   :  { %v1414_v47 = vpop.f32.mrf.mxu0 }
 0x26f   :  { %871 = vmax.xlane.f32.xlu0 %v1930_v46  ;;  %v1935_v49 = vadd.f32 %v1414_v47, %v1916_v25 }
 0x270   :  { %v758_v48 = vpop.f32.mrf.mxu0 }
 0x271   :  { %v1942_v51 = vadd.f32 %v1916_v25, %v758_v48 }
 0x272   :  { %v1415_v39 = vpop.f32.mrf.mxu0 }
 0x273   :  { %v1938_v50 = vadd.f32 %v1415_v39, %v1916_v25  ;;  %881 = vmax.xlane.f32.xlu0 %v1935_v49 }
 0x274   :  { %v761_v2 = vpop.f32.mrf.mxu0 }
 0x275   :  { %883 = vmax.xlane.f32.xlu1 %v1938_v50  ;;  %v1946_v54 = vadd.f32 %v1916_v25, %v761_v2 }
 0x276   :  { %v1418_v52 = vpop.f32.mrf.mxu0 }
 0x277   :  { %877 = vmax.xlane.f32.xlu0 %v1942_v51  ;;  %v1950_v56 = vadd.f32 %v1418_v52, %v1916_v25 }
 0x278   :  { %v774_v55 = vpop.f32.mrf.mxu0 }
 0x279   :  { %879 = vmax.xlane.f32.xlu1 %v1946_v54  ;;  %v1958_v60 = vadd.f32 %v1916_v25, %v774_v55 }
 0x27a   :  { %v1419_v57 = vpop.f32.mrf.mxu0 }
 0x27b   :  { %v1954_v58 = vadd.f32 %v1419_v57, %v1916_v25  ;;  %889 = vmax.xlane.f32.xlu0 %v1950_v56 }
 0x27c   :  { %v777_v59 = vpop.f32.mrf.mxu0 }
 0x27d   :  { %891 = vmax.xlane.f32.xlu1 %v1954_v58  ;;  %v1962_v62 = vadd.f32 %v1916_v25, %v777_v59 }
 0x27e   :  { %v1422_v61 = vpop.f32.mrf.mxu0 }
 0x27f   :  { %885 = vmax.xlane.f32.xlu0 %v1958_v60  ;;  %v1966_v1 = vadd.f32 %v1422_v61, %v1916_v25 }
 0x280   :  { %v790_v63 = vpop.f32.mrf.mxu0 }
 0x281   :  { %887 = vmax.xlane.f32.xlu1 %v1962_v62  ;;  %v1974_v6 = vadd.f32 %v1916_v25, %v790_v63 }
 0x282   :  { %v1423_v4 = vpop.f32.mrf.mxu0 }
 0x283   :  { %v1970_v3 = vadd.f32 %v1423_v4, %v1916_v25  ;;  %897 = vmax.xlane.f32.xlu0 %v1966_v1 }
 0x284   :  { %v793_v5 = vpop.f32.mrf.mxu0 }
 0x285   :  { %899 = vmax.xlane.f32.xlu1 %v1970_v3  ;;  %v1978_v9 = vadd.f32 %v1916_v25, %v793_v5 }
 0x286   :  { %v1426_v8 = vpop.f32.mrf.mxu0 }
 0x287   :  { %893 = vmax.xlane.f32.xlu0 %v1974_v6  ;;  %v1982_v11 = vadd.f32 %v1426_v8, %v1916_v25 }
 0x288   :  { %v806_v10 = vpop.f32.mrf.mxu0 }
 0x289   :  { %895 = vmax.xlane.f32.xlu1 %v1978_v9  ;;  %v1990_v15 = vadd.f32 %v1916_v25, %v806_v10 }
 0x28a   :  { %v1427_v12 = vpop.f32.mrf.mxu0 }
 0x28b   :  { %v1986_v13 = vadd.f32 %v1427_v12, %v1916_v25  ;;  %905 = vmax.xlane.f32.xlu0 %v1982_v11 }
 0x28c   :  { %v809_v14 = vpop.f32.mrf.mxu0 }
 0x28d   :  { %907 = vmax.xlane.f32.xlu1 %v1986_v13  ;;  %v1994_v18 = vadd.f32 %v1916_v25, %v809_v14 }
 0x28e   :  { %v1430_v17 = vpop.f32.mrf.mxu0 }
 0x28f   :  { %901 = vmax.xlane.f32.xlu0 %v1990_v15  ;;  %v1998_v21 = vadd.f32 %v1430_v17, %v1916_v25 }
 0x290   :  { %v822_v19 = vpop.f32.mrf.mxu0 }
 0x291   :  { %903 = vmax.xlane.f32.xlu1 %v1994_v18  ;;  %v2006_v20 = vadd.f32 %v1916_v25, %v822_v19 }
 0x292   :  { %v1431_v22 = vpop.f32.mrf.mxu0 }
 0x293   :  { %v2002_v23 = vadd.f32 %v1431_v22, %v1916_v25  ;;  %913 = vmax.xlane.f32.xlu0 %v1998_v21 }
 0x294   :  { %v825_v24 = vpop.f32.mrf.mxu0 }
 0x295   :  { %915 = vmax.xlane.f32.xlu1 %v2002_v23  ;;  %v2010_v27 = vadd.f32 %v1916_v25, %v825_v24 }
 0x296   :  { %v1434_v26 = vpop.f32.mrf.mxu0 }
 0x297   :  { %909 = vmax.xlane.f32.xlu0 %v2006_v20  ;;  %v2014_v7 = vadd.f32 %v1434_v26, %v1916_v25 }
 0x298   :  { %v838_v0 = vpop.f32.mrf.mxu0 }
 0x299   :  { %911 = vmax.xlane.f32.xlu1 %v2010_v27  ;;  %v2022_v31 = vadd.f32 %v1916_v25, %v838_v0 }
 0x29a   :  { %v1435_v28 = vpop.f32.mrf.mxu0 }
 0x29b   :  { %v2018_v29 = vadd.f32 %v1435_v28, %v1916_v25  ;;  %921 = vmax.xlane.f32.xlu0 %v2014_v7 }
 0x29c   :  { %v841_v30 = vpop.f32.mrf.mxu0 }
 0x29d   :  { %923 = vmax.xlane.f32.xlu1 %v2018_v29  ;;  %v2026_v33 = vadd.f32 %v1916_v25, %v841_v30 }
 0x29e   :  { %v1438_v32 = vpop.f32.mrf.mxu0 }
 0x29f   :  { %917 = vmax.xlane.f32.xlu0 %v2022_v31  ;;  %v2035_v16 = vadd.f32 %v1438_v32, %v1916_v25 }
 0x2a0   :  { %v854_v34 = vpop.f32.mrf.mxu0 }
 0x2a1   :  { %v2030_v35 = vadd.f32 %v1916_v25, %v854_v34  ;;  %919 = vmax.xlane.f32.xlu1 %v2026_v33 }
 0x2a2   :  { %v1439_v36 = vpop.f32.mrf.mxu0 }
 0x2a3   :  { %925 = vmax.xlane.f32.xlu0 %v2030_v35  ;;  %v2043_v40 = vadd.f32 %v1439_v36, %v1916_v25 }
 0x2a4   :  { %v857_v37 = vpop.f32.mrf.mxu0 }
 0x2a5   :  { %v2038_v38 = vadd.f32 %v1916_v25, %v857_v37 }
 0x2a7   :  { %927 = vmax.xlane.f32.xlu1 %v2038_v38  ;;  %929 = vmax.xlane.f32.xlu0 %v2035_v16 }
 0x2ab   :  { %931 = vmax.xlane.f32.xlu1 %v2043_v40 }
 0x2f2   :  { %v874_v42 = vpop.xlane.xlu1 %873 }
 0x2f3   :  { %v935_v43 = vsub.f32 %v1919_v41, %v874_v42 }
 0x2f4   :  { %v870_v45 = vpop.xlane.xlu0 %869 }
 0x2f5   :  { %v969_v47 = vmul.f32 1.442695, %v935_v43  ;;  %v933_v48 = vsub.f32 %v1922_v53, %v870_v45 }
 0x2f6   :  { %v876_v39 = vpop.xlane.xlu1 %875 }
 0x2f7   :  { %1465 = vpow2.f32 %v969_v47  ;;  %v965_v2 = vmul.f32 1.442695, %v933_v48  ;;  %v936_v52 = vsub.f32 %v1926_v44, %v876_v39 }
 0x2f8   :  { %v872_v55 = vpop.xlane.xlu0 %871 }
 0x2f9   :  { %v971_v57 = vmul.f32 1.442695, %v936_v52  ;;  %v934_v59 = vsub.f32 %v1930_v46, %v872_v55  ;;  %1467 = vpow2.f32 %v965_v2 }
 0x2fb   :  { %1469 = vpow2.f32 %v971_v57  ;;  %v967_v25 = vmul.f32 1.442695, %v934_v59 }
 0x2fc   :  { %v882_v61 = vpop.xlane.xlu0 %881 }
 0x2fd   :  { %v939_v63 = vsub.f32 %v1935_v49, %v882_v61  ;;  %1471 = vpow2.f32 %v967_v25 }
 0x2fe   :  { %v884_v41 = vpop.xlane.xlu1 %883 }
 0x2ff   :  { %v977_v4 = vmul.f32 1.442695, %v939_v63  ;;  %v940_v53 = vsub.f32 %v1938_v50, %v884_v41 }
 0x300   :  { %v878_v5 = vpop.xlane.xlu0 %877 }
 0x301   :  { %1473 = vpow2.f32 %v977_v4  ;;  %v979_v8 = vmul.f32 1.442695, %v940_v53  ;;  %v937_v44 = vsub.f32 %v1942_v51, %v878_v5 }
 0x302   :  { %v880_v10 = vpop.xlane.xlu1 %879 }
 0x303   :  { %1475 = vpow2.f32 %v979_v8  ;;  %v973_v12 = vmul.f32 1.442695, %v937_v44  ;;  %v938_v46 = vsub.f32 %v1946_v54, %v880_v10 }
 0x304   :  { %v2054_v14 = vpop.eup %1465  ;;  %v890_v17 = vpop.xlane.xlu0 %889 }
 0x305   :  { %1477 = vpow2.f32 %v973_v12  ;;  %v975_v49 = vmul.f32 1.442695, %v938_v46  ;;  %v943_v19 = vsub.f32 %v1950_v56, %v890_v17  ;;  %1033 = vadd.xlane.f32.xlu0 %v2054_v14 }
 0x306   :  { %v892_v50 = vpop.xlane.xlu1 %891  ;;  %v2058_v22 = vpop.eup %1467 }
 0x307   :  { %1479 = vpow2.f32 %v975_v49  ;;  %v985_v24 = vmul.f32 1.442695, %v943_v19  ;;  %v944_v51 = vsub.f32 %v1954_v58, %v892_v50 }
 0x308   :  { %v2061_v26 = vpop.eup %1469  ;;  %v886_v0 = vpop.xlane.xlu0 %885 }
 0x309   :  { %1481 = vpow2.f32 %v985_v24  ;;  %v987_v54 = vmul.f32 1.442695, %v944_v51  ;;  %v941_v28 = vsub.f32 %v1958_v60, %v886_v0  ;;  %1035 = vadd.xlane.f32.xlu1 %v2061_v26  ;;  %1029 = vadd.xlane.f32.xlu0 %v2058_v22 }
 0x30a   :  { %v888_v56 = vpop.xlane.xlu1 %887  ;;  %v2067_v34 = vpop.eup %1471 }
 0x30b   :  { %1483 = vpow2.f32 %v987_v54  ;;  %v981_v30 = vmul.f32 1.442695, %v941_v28  ;;  %v942_v32 = vsub.f32 %v1962_v62, %v888_v56 }
 0x30c   :  { %v898_v36 = vpop.xlane.xlu0 %897 }
 0x30d   :  { %1485 = vpow2.f32 %v981_v30  ;;  %v983_v58 = vmul.f32 1.442695, %v942_v32  ;;  %v947_v37 = vsub.f32 %v1966_v1, %v898_v36  ;;  %1031 = vadd.xlane.f32.xlu1 %v2067_v34 }
 0x30e   :  { %v2071_v42 = vpop.eup %1473  ;;  %v900_v60 = vpop.xlane.xlu1 %899 }
 0x30f   :  { %1487 = vpow2.f32 %v983_v58  ;;  %v993_v43 = vmul.f32 1.442695, %v947_v37  ;;  %v948_v45 = vsub.f32 %v1970_v3, %v900_v60  ;;  %1041 = vadd.xlane.f32.xlu0 %v2071_v42 }
 0x310   :  { %v2075_v47 = vpop.eup %1475  ;;  %v894_v62 = vpop.xlane.xlu0 %893 }
 0x311   :  { %1489 = vpow2.f32 %v993_v43  ;;  %v995_v48 = vmul.f32 1.442695, %v948_v45  ;;  %v945_v39 = vsub.f32 %v1974_v6, %v894_v62  ;;  %1043 = vadd.xlane.f32.xlu1 %v2075_v47 }
 0x312   :  { %v2079_v1 = vpop.eup %1477  ;;  %v896_v2 = vpop.xlane.xlu1 %895 }
 0x313   :  { %1491 = vpow2.f32 %v995_v48  ;;  %v989_v52 = vmul.f32 1.442695, %v945_v39  ;;  %v946_v55 = vsub.f32 %v1978_v9, %v896_v2  ;;  %1037 = vadd.xlane.f32.xlu0 %v2079_v1 }
 0x314   :  { %v2083_v3 = vpop.eup %1479  ;;  %v906_v57 = vpop.xlane.xlu0 %905 }
 0x315   :  { %1493 = vpow2.f32 %v989_v52  ;;  %v991_v59 = vmul.f32 1.442695, %v946_v55  ;;  %v951_v25 = vsub.f32 %v1982_v11, %v906_v57  ;;  %1039 = vadd.xlane.f32.xlu1 %v2083_v3 }
 0x316   :  { %v2087_v6 = vpop.eup %1481  ;;  %v908_v61 = vpop.xlane.xlu1 %907 }
 0x317   :  { %1495 = vpow2.f32 %v991_v59  ;;  %v1001_v63 = vmul.f32 1.442695, %v951_v25  ;;  %v952_v41 = vsub.f32 %v1986_v13, %v908_v61  ;;  %1049 = vadd.xlane.f32.xlu0 %v2087_v6 }
 0x318   :  { %v2091_v9 = vpop.eup %1483  ;;  %v902_v4 = vpop.xlane.xlu0 %901 }
 0x319   :  { %1497 = vpow2.f32 %v1001_v63  ;;  %v1003_v53 = vmul.f32 1.442695, %v952_v41  ;;  %v949_v5 = vsub.f32 %v1990_v15, %v902_v4  ;;  %1051 = vadd.xlane.f32.xlu1 %v2091_v9 }
 0x31a   :  { %v2095_v11 = vpop.eup %1485  ;;  %v904_v8 = vpop.xlane.xlu1 %903 }
 0x31b   :  { %1499 = vpow2.f32 %v1003_v53  ;;  %v997_v44 = vmul.f32 1.442695, %v949_v5  ;;  %v950_v10 = vsub.f32 %v1994_v18, %v904_v8  ;;  %1045 = vadd.xlane.f32.xlu0 %v2095_v11 }
 0x31c   :  { %v2099_v13 = vpop.eup %1487  ;;  %v914_v12 = vpop.xlane.xlu0 %913 }
 0x31d   :  { %1501 = vpow2.f32 %v997_v44  ;;  %v999_v46 = vmul.f32 1.442695, %v950_v10  ;;  %v955_v17 = vsub.f32 %v1998_v21, %v914_v12  ;;  %1047 = vadd.xlane.f32.xlu1 %v2099_v13 }
 0x31e   :  { %v2103_v15 = vpop.eup %1489  ;;  %v916_v49 = vpop.xlane.xlu1 %915 }
 0x31f   :  { %1503 = vpow2.f32 %v999_v46  ;;  %v1009_v19 = vmul.f32 1.442695, %v955_v17  ;;  %v956_v50 = vsub.f32 %v2002_v23, %v916_v49  ;;  %1057 = vadd.xlane.f32.xlu0 %v2103_v15 }
 0x320   :  { %v2107_v18 = vpop.eup %1491  ;;  %v910_v24 = vpop.xlane.xlu0 %909 }
 0x321   :  { %1505 = vpow2.f32 %v1009_v19  ;;  %v1011_v51 = vmul.f32 1.442695, %v956_v50  ;;  %v953_v0 = vsub.f32 %v2006_v20, %v910_v24  ;;  %1059 = vadd.xlane.f32.xlu1 %v2107_v18 }
 0x322   :  { %v2111_v21 = vpop.eup %1493  ;;  %v912_v54 = vpop.xlane.xlu1 %911 }
 0x323   :  { %1507 = vpow2.f32 %v1011_v51  ;;  %v1005_v28 = vmul.f32 1.442695, %v953_v0  ;;  %v954_v56 = vsub.f32 %v2010_v27, %v912_v54  ;;  %1053 = vadd.xlane.f32.xlu0 %v2111_v21 }
 0x324   :  { %v2115_v23 = vpop.eup %1495  ;;  %v922_v30 = vpop.xlane.xlu0 %921 }
 0x325   :  { %1509 = vpow2.f32 %v1005_v28  ;;  %v1007_v32 = vmul.f32 1.442695, %v954_v56  ;;  %v959_v36 = vsub.f32 %v2014_v7, %v922_v30  ;;  %1055 = vadd.xlane.f32.xlu1 %v2115_v23 }
 0x326   :  { %v2119_v20 = vpop.eup %1497  ;;  %v924_v58 = vpop.xlane.xlu1 %923 }
 0x327   :  { %1511 = vpow2.f32 %v1007_v32  ;;  %v1017_v37 = vmul.f32 1.442695, %v959_v36  ;;  %v960_v60 = vsub.f32 %v2018_v29, %v924_v58  ;;  %1065 = vadd.xlane.f32.xlu0 %v2119_v20 }
 0x328   :  { %v2123_v27 = vpop.eup %1499  ;;  %v918_v43 = vpop.xlane.xlu0 %917 }
 0x329   :  { %1513 = vpow2.f32 %v1017_v37  ;;  %v1019_v45 = vmul.f32 1.442695, %v960_v60  ;;  %v957_v62 = vsub.f32 %v2022_v31, %v918_v43  ;;  %1067 = vadd.xlane.f32.xlu1 %v2123_v27 }
 0x32a   :  { %v2127_v7 = vpop.eup %1501  ;;  %v920_v48 = vpop.xlane.xlu1 %919 }
 0x32b   :  { %1515 = vpow2.f32 %v1019_v45  ;;  %v1013_v39 = vmul.f32 1.442695, %v957_v62  ;;  %v958_v2 = vsub.f32 %v2026_v33, %v920_v48  ;;  %1061 = vadd.xlane.f32.xlu0 %v2127_v7 }
 0x32c   :  { %v2131_v29 = vpop.eup %1503  ;;  %v926_v52 = vpop.xlane.xlu0 %925 }
 0x32d   :  { %1517 = vpow2.f32 %v1013_v39  ;;  %v1015_v55 = vmul.f32 1.442695, %v958_v2  ;;  %v961_v57 = vsub.f32 %v2030_v35, %v926_v52  ;;  %1063 = vadd.xlane.f32.xlu1 %v2131_v29 }
 0x32e   :  { %v2135_v31 = vpop.eup %1505 }
 0x32f   :  { %1519 = vpow2.f32 %v1015_v55  ;;  %v1021_v59 = vmul.f32 1.442695, %v961_v57  ;;  %1073 = vadd.xlane.f32.xlu0 %v2135_v31 }
 0x330   :  { %v2138_v25 = vpop.eup %1507  ;;  %v928_v33 = vpop.xlane.xlu1 %927 }
 0x331   :  { %v930_v61 = vpop.xlane.xlu0 %929  ;;  %1521 = vpow2.f32 %v1021_v59  ;;  %v962_v63 = vsub.f32 %v2038_v38, %v928_v33  ;;  %1075 = vadd.xlane.f32.xlu1 %v2138_v25 }
 0x332   :  { %v963_v41 = vsub.f32 %v2035_v16, %v930_v61  ;;  %v2143_v35 = vpop.eup %1509 }
 0x333   :  { %v1023_v4 = vmul.f32 1.442695, %v962_v63  ;;  %1069 = vadd.xlane.f32.xlu0 %v2143_v35 }
 0x334   :  { %v1025_v53 = vmul.f32 1.442695, %v963_v41  ;;  %v2146_v5 = vpop.eup %1511  ;;  %v932_v8 = vpop.xlane.xlu1 %931 }
 0x335   :  { %1523 = vpow2.f32 %v1023_v4  ;;  %v964_v44 = vsub.f32 %v2043_v40, %v932_v8  ;;  %1071 = vadd.xlane.f32.xlu1 %v2146_v5 }
 0x336   :  { %v2150_v10 = vpop.eup %1513  ;;  %1525 = vpow2.f32 %v1025_v53 }
 0x337   :  { %v1027_v16 = vmul.f32 1.442695, %v964_v44  ;;  %1081 = vadd.xlane.f32.xlu0 %v2150_v10 }
 0x338   :  { %v2153_v38 = vpop.eup %1515 }
 0x339   :  { %1527 = vpow2.f32 %v1027_v16  ;;  %1083 = vadd.xlane.f32.xlu1 %v2153_v38 }
 0x33a   :  { %v2156_v12 = vpop.eup %1517 }
 0x33b   :  { %1077 = vadd.xlane.f32.xlu0 %v2156_v12 }
 0x33c   :  { %v2159_v46 = vpop.eup %1519 }
 0x33d   :  { %1079 = vadd.xlane.f32.xlu1 %v2159_v46 }
 0x33e   :  { %v2162_v40 = vpop.eup %1521 }
 0x33f   :  { %1085 = vadd.xlane.f32.xlu0 %v2162_v40 }
 0x342   :  { %v2165_v17 = vpop.eup %1523 }
 0x343   :  { %v2167_v49 = vpop.eup %1525  ;;  %1087 = vadd.xlane.f32.xlu1 %v2165_v17 }
 0x344   :  { %1089 = vadd.xlane.f32.xlu0 %v2167_v49 }
 0x346   :  { %v2171_v19 = vpop.eup %1527 }
 0x347   :  { %1091 = vadd.xlane.f32.xlu1 %v2171_v19 }
 0x38e   :  { %v1034_v50 = vpop.xlane.xlu0 %1033 }
 0x38f   :  { %1529 = vrcp.f32 %v1034_v50 }
 0x392   :  { %v1036_v24 = vpop.xlane.xlu1 %1035  ;;  %v1030_v51 = vpop.xlane.xlu0 %1029 }
 0x393   :  { %1531 = vrcp.f32 %v1036_v24 }
 0x394   :  { %1533 = vrcp.f32 %v1030_v51 }
 0x396   :  { %v1032_v0 = vpop.xlane.xlu1 %1031 }
 0x397   :  { %1535 = vrcp.f32 %v1032_v0 }
 0x398   :  { %v1042_v54 = vpop.xlane.xlu0 %1041 }
 0x399   :  { %1537 = vrcp.f32 %v1042_v54 }
 0x39a   :  { %v1044_v28 = vpop.xlane.xlu1 %1043 }
 0x39b   :  { %1539 = vrcp.f32 %v1044_v28 }
 0x39c   :  { %v1530_v56 = vpop.eup %1529  ;;  %v1038_v30 = vpop.xlane.xlu0 %1037 }
 0x39d   :  { %v1127_v32 = vmul.f32 %v1530_v56, %v2054_v14  ;;  %1541 = vrcp.f32 %v1038_v30 }
 0x39e   :  { %v1040_v36 = vpop.xlane.xlu1 %1039 }
 0x39f   :  { %1159 = vst [vmem:[#allocation2 + $0x10] sm:$0xff] %v1127_v32  ;;  %1543 = vrcp.f32 %v1040_v36 }
 0x3a0   :  { %v1532_v58 = vpop.eup %1531  ;;  %v1050_v37 = vpop.xlane.xlu0 %1049 }
 0x3a1   :  { %v1534_v60 = vpop.eup %1533  ;;  %v1128_v43 = vmul.f32 %v1532_v58, %v2061_v26  ;;  %1545 = vrcp.f32 %v1050_v37 }
 0x3a2   :  { %v1125_v45 = vmul.f32 %v1534_v60, %v2058_v22  ;;  %v1052_v62 = vpop.xlane.xlu1 %1051 }
 0x3a3   :  { %1160 = vst [vmem:[#allocation2 + $0x18] sm:$0xff] %v1128_v43  ;;  %1547 = vrcp.f32 %v1052_v62 }
 0x3a4   :  { %v1536_v48 = vpop.eup %1535  ;;  %1157 = vst [vmem:[#allocation2] sm:$0xff] %v1125_v45  ;;  %v1046_v39 = vpop.xlane.xlu0 %1045 }
 0x3a5   :  { %v1126_v14 = vmul.f32 %v1536_v48, %v2067_v34  ;;  %1549 = vrcp.f32 %v1046_v39 }
 0x3a6   :  { %v1538_v2 = vpop.eup %1537  ;;  %v1048_v52 = vpop.xlane.xlu1 %1047 }
 0x3a7   :  { %1158 = vst [vmem:[#allocation2 + $0x8] sm:$0xff] %v1126_v14  ;;  %v1131_v55 = vmul.f32 %v1538_v2, %v2071_v42  ;;  %1551 = vrcp.f32 %v1048_v52 }
 0x3a8   :  { %v1540_v57 = vpop.eup %1539  ;;  %v1058_v26 = vpop.xlane.xlu0 %1057 }
 0x3a9   :  { %1163 = vst [vmem:[#allocation2 + $0x30] sm:$0xff] %v1131_v55  ;;  %v1132_v22 = vmul.f32 %v1540_v57, %v2075_v47  ;;  %1553 = vrcp.f32 %v1058_v26 }
 0x3aa   :  { %v1542_v59 = vpop.eup %1541  ;;  %v1060_v33 = vpop.xlane.xlu1 %1059 }
 0x3ab   :  { %1164 = vst [vmem:[#allocation2 + $0x38] sm:$0xff] %v1132_v22  ;;  %v1129_v61 = vmul.f32 %v1542_v59, %v2079_v1  ;;  %1555 = vrcp.f32 %v1060_v33 }
 0x3ac   :  { %v1544_v34 = vpop.eup %1543  ;;  %v1054_v63 = vpop.xlane.xlu0 %1053 }
 0x3ad   :  { %1161 = vst [vmem:[#allocation2 + $0x20] sm:$0xff] %v1129_v61  ;;  %v1130_v41 = vmul.f32 %v1544_v34, %v2083_v3  ;;  %1557 = vrcp.f32 %v1054_v63 }
 0x3ae   :  { %v1546_v42 = vpop.eup %1545  ;;  %v1056_v4 = vpop.xlane.xlu1 %1055 }
 0x3af   :  { %1162 = vst [vmem:[#allocation2 + $0x28] sm:$0xff] %v1130_v41  ;;  %v1135_v53 = vmul.f32 %v1546_v42, %v2087_v6  ;;  %1559 = vrcp.f32 %v1056_v4 }
 0x3b0   :  { %v1548_v47 = vpop.eup %1547  ;;  %v1066_v8 = vpop.xlane.xlu0 %1065 }
 0x3b1   :  { %1167 = vst [vmem:[#allocation2 + $0x50] sm:$0xff] %v1135_v53  ;;  %v1136_v44 = vmul.f32 %v1548_v47, %v2091_v9  ;;  %1561 = vrcp.f32 %v1066_v8 }
 0x3b2   :  { %v1550_v1 = vpop.eup %1549  ;;  %v1068_v16 = vpop.xlane.xlu1 %1067 }
 0x3b3   :  { %1168 = vst [vmem:[#allocation2 + $0x58] sm:$0xff] %v1136_v44  ;;  %v1133_v50 = vmul.f32 %v1550_v1, %v2095_v11  ;;  %1563 = vrcp.f32 %v1068_v16 }
 0x3b4   :  { %v1552_v3 = vpop.eup %1551  ;;  %v1062_v24 = vpop.xlane.xlu0 %1061 }
 0x3b5   :  { %1165 = vst [vmem:[#allocation2 + $0x40] sm:$0xff] %v1133_v50  ;;  %v1134_v51 = vmul.f32 %v1552_v3, %v2099_v13  ;;  %1565 = vrcp.f32 %v1062_v24 }
 0x3b6   :  { %v1554_v6 = vpop.eup %1553  ;;  %v1064_v0 = vpop.xlane.xlu1 %1063 }
 0x3b7   :  { %1166 = vst [vmem:[#allocation2 + $0x48] sm:$0xff] %v1134_v51  ;;  %v1139_v54 = vmul.f32 %v1554_v6, %v2103_v15  ;;  %1567 = vrcp.f32 %v1064_v0 }
 0x3b8   :  { %v1556_v9 = vpop.eup %1555  ;;  %v1074_v28 = vpop.xlane.xlu0 %1073 }
 0x3b9   :  { %1171 = vst [vmem:[#allocation2 + $0x70] sm:$0xff] %v1139_v54  ;;  %v1140_v56 = vmul.f32 %v1556_v9, %v2107_v18  ;;  %1569 = vrcp.f32 %v1074_v28 }
 0x3ba   :  { %v1558_v11 = vpop.eup %1557  ;;  %v1076_v30 = vpop.xlane.xlu1 %1075 }
 0x3bb   :  { %1172 = vst [vmem:[#allocation2 + $0x78] sm:$0xff] %v1140_v56  ;;  %v1137_v32 = vmul.f32 %v1558_v11, %v2111_v21  ;;  %1571 = vrcp.f32 %v1076_v30 }
 0x3bc   :  { %v1560_v13 = vpop.eup %1559  ;;  %v1070_v36 = vpop.xlane.xlu0 %1069 }
 0x3bd   :  { %1169 = vst [vmem:[#allocation2 + $0x60] sm:$0xff] %v1137_v32  ;;  %v1138_v58 = vmul.f32 %v1560_v13, %v2115_v23  ;;  %1573 = vrcp.f32 %v1070_v36 }
 0x3be   :  { %v1562_v15 = vpop.eup %1561  ;;  %v1072_v37 = vpop.xlane.xlu1 %1071 }
 0x3bf   :  { %1170 = vst [vmem:[#allocation2 + $0x68] sm:$0xff] %v1138_v58  ;;  %v1143_v60 = vmul.f32 %v1562_v15, %v2119_v20  ;;  %1575 = vrcp.f32 %v1072_v37 }
 0x3c0   :  { %v1564_v18 = vpop.eup %1563  ;;  %v1082_v43 = vpop.xlane.xlu0 %1081 }
 0x3c1   :  { %1175 = vst [vmem:[#allocation2 + $0x90] sm:$0xff] %v1143_v60  ;;  %v1144_v45 = vmul.f32 %v1564_v18, %v2123_v27  ;;  %1577 = vrcp.f32 %v1082_v43 }
 0x3c2   :  { %v1566_v21 = vpop.eup %1565  ;;  %v1084_v62 = vpop.xlane.xlu1 %1083 }
 0x3c3   :  { %1176 = vst [vmem:[#allocation2 + $0x98] sm:$0xff] %v1144_v45  ;;  %v1141_v48 = vmul.f32 %v1566_v21, %v2127_v7  ;;  %1579 = vrcp.f32 %v1084_v62 }
 0x3c4   :  { %v1568_v23 = vpop.eup %1567  ;;  %v1078_v39 = vpop.xlane.xlu0 %1077 }
 0x3c5   :  { %1173 = vst [vmem:[#allocation2 + $0x80] sm:$0xff] %v1141_v48  ;;  %v1142_v14 = vmul.f32 %v1568_v23, %v2131_v29  ;;  %1581 = vrcp.f32 %v1078_v39 }
 0x3c6   :  { %v1570_v20 = vpop.eup %1569  ;;  %v1080_v2 = vpop.xlane.xlu1 %1079 }
 0x3c7   :  { %1174 = vst [vmem:[#allocation2 + $0x88] sm:$0xff] %v1142_v14  ;;  %v1147_v52 = vmul.f32 %v1570_v20, %v2135_v31  ;;  %1583 = vrcp.f32 %v1080_v2 }
 0x3c8   :  { %v1572_v27 = vpop.eup %1571  ;;  %v1086_v55 = vpop.xlane.xlu0 %1085 }
 0x3c9   :  { %1179 = vst [vmem:[#allocation2 + $0xb0] sm:$0xff] %v1147_v52  ;;  %v1148_v57 = vmul.f32 %v1572_v27, %v2138_v25  ;;  %1585 = vrcp.f32 %v1086_v55 }
 0x3ca   :  { %v1574_v7 = vpop.eup %1573 }
 0x3cb   :  { %1180 = vst [vmem:[#allocation2 + $0xb8] sm:$0xff] %v1148_v57  ;;  %v1145_v26 = vmul.f32 %v1574_v7, %v2143_v35 }
 0x3cc   :  { %v1576_v22 = vpop.eup %1575  ;;  %v1088_v59 = vpop.xlane.xlu1 %1087 }
 0x3cd   :  { %1177 = vst [vmem:[#allocation2 + $0xa0] sm:$0xff] %v1145_v26  ;;  %v1146_v29 = vmul.f32 %v1576_v22, %v2146_v5  ;;  %1587 = vrcp.f32 %v1088_v59  ;;  %v1090_v33 = vpop.xlane.xlu0 %1089 }
 0x3ce   :  { %v1578_v61 = vpop.eup %1577  ;;  %1589 = vrcp.f32 %v1090_v33 }
 0x3cf   :  { %1178 = vst [vmem:[#allocation2 + $0xa8] sm:$0xff] %v1146_v29  ;;  %v1151_v31 = vmul.f32 %v1578_v61, %v2150_v10 }
 0x3d0   :  { %v1580_v34 = vpop.eup %1579  ;;  %v1092_v63 = vpop.xlane.xlu1 %1091 }
 0x3d1   :  { %1183 = vst [vmem:[#allocation2 + $0xd0] sm:$0xff] %v1151_v31  ;;  %v1152_v25 = vmul.f32 %v1580_v34, %v2153_v38  ;;  %1591 = vrcp.f32 %v1092_v63 }
 0x3d2   :  { %v1582_v41 = vpop.eup %1581 }
 0x3d3   :  { %1184 = vst [vmem:[#allocation2 + $0xd8] sm:$0xff] %v1152_v25  ;;  %v1149_v35 = vmul.f32 %v1582_v41, %v2156_v12 }
 0x3d4   :  { %v1584_v42 = vpop.eup %1583 }
 0x3d5   :  { %1181 = vst [vmem:[#allocation2 + $0xc0] sm:$0xff] %v1149_v35  ;;  %v1150_v5 = vmul.f32 %v1584_v42, %v2159_v46 }
 0x3d6   :  { %v1586_v4 = vpop.eup %1585 }
 0x3d7   :  { %1182 = vst [vmem:[#allocation2 + $0xc8] sm:$0xff] %v1150_v5  ;;  %v1153_v53 = vmul.f32 %v1586_v4, %v2162_v40 }
 0x3d9   :  { %1185 = vst [vmem:[#allocation2 + $0xe0] sm:$0xff] %v1153_v53 }
 0x3da   :  { %v1588_v10 = vpop.eup %1587 }
 0x3db   :  { %v1590_v47 = vpop.eup %1589  ;;  %v1154_v8 = vmul.f32 %v1588_v10, %v2165_v17 }
 0x3dc   :  { %v1155_v38 = vmul.f32 %v1590_v47, %v2167_v49 }
 0x3dd   :  { %1186 = vst [vmem:[#allocation2 + $0xe8] sm:$0xff] %v1154_v8 }
 0x3de   :  { %v1592_v44 = vpop.eup %1591  ;;  %1187 = vst [vmem:[#allocation2 + $0xf0] sm:$0xff] %v1155_v38 }
 0x3df   :  { %v1156_v12 = vmul.f32 %v1592_v44, %v2171_v19 }
 0x3e1   :  { %1188 = vst [vmem:[#allocation2 + $0xf8] sm:$0xff] %v1156_v12 }
 0x3e2   :  { %1604 = shalt.err (!%p1601_p4)
}
 0x3e3   :  { %s1616_s8 = smov 128   ;;  %s1617_s9 = smov 8  }
 0x3e4   :  { %1200 = dma.vmem_to_hbm [thread:$0]  %s1195_s29, 4096, %s2216_s7, [#allocation3], %s1616_s8, %s1616_s8, %s1617_s9  }
 0x3e5   :  { %1613 = dma.done.wait [#allocation3], 4096  }
 0x3e6   :  { %1614 = vsyncadd [#allocation3], 4294963200 }
 0x3e7   :  { %1204 = vsyncpa [#allocation3], 1 }

</bundles_post_ra>
